<compile_context>
chip_gen: v5e
topology: v5e:2x2
jax: 0.10.0
libtpu: 0.0.40
codegen_flags: <defaults>
</compile_context>

<pallas_src>
import jax
import jax.numpy as jnp
from jax import lax
from jax.experimental import pallas as pl
from jax.experimental.pallas import tpu as pltpu

D = 20  # feature width fixed by the module (nn.Linear(20, 20))

# Row offsets inside the packed parameter slab (sublane-tile aligned starts).
_WR_OFF = 0      # rows  0:20 -> Wr = W.T @ rand_weight   (folded first 2 matmuls)
_WT_OFF = 24     # rows 24:44 -> Wt = W.T
_BR_OFF = 48     # row  48    -> br = b @ rand_weight + 1
_B_OFF = 49      # row  49    -> b
_SLAB_ROWS = 56  # padded to a multiple of 8 sublanes


def fixed_hidden_mlp_kernel(x_ref, p_ref, out_ref):
    x = x_ref[...]                                    # (B, 20)
    B = x.shape[0]
    wr = p_ref[_WR_OFF:_WR_OFF + D, :]                # (20, 20)
    wt = p_ref[_WT_OFF:_WT_OFF + D, :]                # (20, 20)
    br = p_ref[_BR_OFF:_BR_OFF + 1, :]                # (1, 20)
    b = p_ref[_B_OFF:_B_OFF + 1, :]                   # (1, 20)

    # h = relu((x @ W.T + b) @ R + 1)  ==  relu(x @ Wr + br)   (folded)
    h = jnp.maximum(jnp.dot(x, wr, preferred_element_type=jnp.float32) + br, 0.0)
    # h = h @ W.T + b    (same Linear, shared weights)
    h = jnp.dot(h, wt, preferred_element_type=jnp.float32) + b

    # sum(h) and sum(|h|) via a single lane reduction over the stacked tensor.
    both = jnp.concatenate([h, jnp.abs(h)], axis=0)           # (2B, 20)
    row = jnp.sum(both, axis=1, keepdims=True)                # (2B, 1)
    total = jnp.sum(row[:B, :], axis=0, keepdims=True)        # (1, 1)
    abs_sum = jnp.sum(row[B:, :], axis=0, keepdims=True)      # (1, 1)

    # while |h|.sum() > 1: h /= 2   -> closed-form halving count n.
    # Halving is exact in fp32, so n depends only on abs_sum's exponent bits:
    # for abs_sum in (2^k, 2^(k+1)) the loop runs k+1 times; exactly 2^k -> k;
    # abs_sum <= 1 (or NaN) -> 0.
    bits = pltpu.bitcast(abs_sum, jnp.int32)                  # (1, 1) i32
    exp = (bits >> 23) & 0xFF                                 # biased exponent
    mant = bits & 0x7FFFFF
    n = (exp - 127) + (mant != 0).astype(jnp.int32)
    n = jnp.where(abs_sum > 1.0, n, 0)
    n = jnp.clip(n, 0, 126)      # keep 2^-n normal (inf abs_sum hangs the ref loop anyway)
    scale = pltpu.bitcast((127 - n) << 23, jnp.float32)       # exact 2^(-n)
    out_ref[...] = total * scale                              # == sum(h / 2^n)


def prepare_fixed_hidden_mlp_params(w, b, rand_weight):
    """One-time fold of the constant weight algebra + packing into one slab."""
    wt = w.astype(jnp.float32).T                     # (20, 20) = W.T
    r = rand_weight.astype(jnp.float32)              # (20, 20)
    b2 = b.astype(jnp.float32).reshape(1, D)         # (1, 20)
    wr = wt @ r                                      # fold Linear -> rand_weight matmul
    br = b2 @ r + 1.0
    slab = jnp.zeros((_SLAB_ROWS, D), jnp.float32)
    slab = slab.at[_WR_OFF:_WR_OFF + D].set(wr)
    slab = slab.at[_WT_OFF:_WT_OFF + D].set(wt)
    slab = slab.at[_BR_OFF].set(br[0])
    slab = slab.at[_B_OFF].set(b2[0])
    return slab


@jax.jit
def fixed_hidden_mlp(x, params):
    """x: (B, 20) f32; params: packed slab from prepare_fixed_hidden_mlp_params."""
    out = pl.pallas_call(
        fixed_hidden_mlp_kernel,
        out_shape=jax.ShapeDtypeStruct((1, 1), jnp.float32),
        in_specs=[
            pl.BlockSpec(memory_space=pltpu.MemorySpace.VMEM),
            pl.BlockSpec(memory_space=pltpu.MemorySpace.VMEM),
        ],
        out_specs=pl.BlockSpec(memory_space=pltpu.MemorySpace.VMEM),
        cost_estimate=pl.CostEstimate(
            flops=2 * (2 * x.shape[0] * D * D),
            transcendentals=0,
            bytes_accessed=(x.size + _SLAB_ROWS * D + 1) * 4,
        ),
    )(x.astype(jnp.float32), params)
    return out[0, 0]


def fixed_hidden_mlp_ref(x, w, b, rand_weight):
    """Pure-JAX reference (faithful, unfolded, with the actual while loop)."""
    h = x @ w.T + b
    h = jnp.maximum(h @ rand_weight + 1.0, 0.0)
    h = h @ w.T + b

    def cond(hh):
        return jnp.sum(jnp.abs(hh)) > 1.0

    def body(hh):
        return hh / 2.0

    h = lax.while_loop(cond, body, h)
    return jnp.sum(h)


if __name__ == "__main__":
    key = jax.random.PRNGKey(0)
    k_x, k_w, k_b, k_r = jax.random.split(key, 4)

    B = 2
    x = jax.random.normal(k_x, (B, D), dtype=jnp.float32)
    # nn.Linear(20, 20): weight (20, 20), bias (20,)  (uniform-ish init, deterministic)
    bound = 1.0 / (D ** 0.5)
    w = jax.random.uniform(k_w, (D, D), minval=-bound, maxval=bound, dtype=jnp.float32)
    b = jax.random.uniform(k_b, (D,), minval=-bound, maxval=bound, dtype=jnp.float32)
    # torch.rand(20, 20): uniform [0, 1), fixed (no grad)
    rand_weight = jax.random.uniform(k_r, (D, D), minval=0.0, maxval=1.0, dtype=jnp.float32)

    params = prepare_fixed_hidden_mlp_params(w, b, rand_weight)  # one-time prep
    out = fixed_hidden_mlp(x, params)
    jax.block_until_ready(out)

    ref = fixed_hidden_mlp_ref(x, w, b, rand_weight)
    assert jnp.allclose(out, ref, rtol=1e-4, atol=1e-5), (out, ref)
    print("KERNEL_OK")
</pallas_src>

<mosaic_0001>
module attributes {stable_mosaic.version = 11 : i64} {
  func.func @fixed_hidden_mlp_kernel(%arg0: memref<2x20xf32, #tpu.memory_space<vmem>>, %arg1: memref<56x20xf32, #tpu.memory_space<vmem>>, %arg2: memref<1x1xf32, #tpu.memory_space<vmem>>) attributes {dimension_semantics = [], scalar_prefetch = 0 : i64, scratch_operands = 0 : i64, tpu.core_type = #tpu.core_type<tc>} {
    %c0 = arith.constant 0 : index
    %c0_0 = arith.constant 0 : index
    %0 = vector.load %arg0[%c0, %c0_0] : memref<2x20xf32, #tpu.memory_space<vmem>>, vector<2x20xf32>
    %c0_1 = arith.constant 0 : index
    %c0_2 = arith.constant 0 : index
    %1 = vector.load %arg1[%c0_1, %c0_2] : memref<56x20xf32, #tpu.memory_space<vmem>>, vector<20x20xf32>
    %c24 = arith.constant 24 : index
    %c0_3 = arith.constant 0 : index
    %2 = vector.load %arg1[%c24, %c0_3] : memref<56x20xf32, #tpu.memory_space<vmem>>, vector<20x20xf32>
    %c48 = arith.constant 48 : index
    %c0_4 = arith.constant 0 : index
    %3 = vector.load %arg1[%c48, %c0_4] : memref<56x20xf32, #tpu.memory_space<vmem>>, vector<1x20xf32>
    %c49 = arith.constant 49 : index
    %c0_5 = arith.constant 0 : index
    %4 = vector.load %arg1[%c49, %c0_5] : memref<56x20xf32, #tpu.memory_space<vmem>>, vector<1x20xf32>
    %cst = arith.constant dense<0.000000e+00> : vector<2x20xf32>
    %5 = tpu.matmul %0, %1, %cst {dimension_numbers = #tpu.dot_dimension_numbers<[1], [0], [0], [1], [0, 0, 1, 1], [], []>} : vector<2x20xf32>, vector<20x20xf32>, vector<2x20xf32> -> vector<2x20xf32>
    %6 = vector.broadcast %3 : vector<1x20xf32> to vector<2x20xf32>
    %7 = arith.addf %5, %6 : vector<2x20xf32>
    %cst_6 = arith.constant 0.000000e+00 : f32
    %8 = vector.broadcast %cst_6 : f32 to vector<2x20xf32>
    %9 = arith.maximumf %7, %8 : vector<2x20xf32>
    %cst_7 = arith.constant dense<0.000000e+00> : vector<2x20xf32>
    %10 = tpu.matmul %9, %2, %cst_7 {dimension_numbers = #tpu.dot_dimension_numbers<[1], [0], [0], [1], [0, 0, 1, 1], [], []>} : vector<2x20xf32>, vector<20x20xf32>, vector<2x20xf32> -> vector<2x20xf32>
    %11 = vector.broadcast %4 : vector<1x20xf32> to vector<2x20xf32>
    %12 = arith.addf %10, %11 : vector<2x20xf32>
    %13 = math.absf %12 : vector<2x20xf32>
    %14 = tpu.concatenate %12, %13 in 0 : vector<2x20xf32>, vector<2x20xf32> -> vector<4x20xf32>
    %cst_8 = arith.constant dense<0.000000e+00> : vector<4xf32>
    %15 = vector.multi_reduction <add>, %14, %cst_8 [1] : vector<4x20xf32> to vector<4xf32>
    %16 = vector.shape_cast %15 : vector<4xf32> to vector<4x1xf32>
    %17 = vector.extract_strided_slice %16 {offsets = [0, 0], sizes = [2, 1], strides = [1, 1]} : vector<4x1xf32> to vector<2x1xf32>
    %cst_9 = arith.constant dense<0.000000e+00> : vector<1xf32>
    %18 = vector.multi_reduction <add>, %17, %cst_9 [0] : vector<2x1xf32> to vector<1xf32>
    %19 = vector.shape_cast %18 : vector<1xf32> to vector<1x1xf32>
    %20 = vector.extract_strided_slice %16 {offsets = [2, 0], sizes = [2, 1], strides = [1, 1]} : vector<4x1xf32> to vector<2x1xf32>
    %cst_10 = arith.constant dense<0.000000e+00> : vector<1xf32>
    %21 = vector.multi_reduction <add>, %20, %cst_10 [0] : vector<2x1xf32> to vector<1xf32>
    %22 = vector.shape_cast %21 : vector<1xf32> to vector<1x1xf32>
    %23 = tpu.bitcast %22 : vector<1x1xf32> -> vector<1x1xi32>
    %c23_i32 = arith.constant 23 : i32
    %24 = vector.broadcast %c23_i32 : i32 to vector<1x1xi32>
    %25 = arith.shrsi %23, %24 : vector<1x1xi32>
    %c255_i32 = arith.constant 255 : i32
    %26 = vector.broadcast %c255_i32 : i32 to vector<1x1xi32>
    %27 = arith.andi %25, %26 : vector<1x1xi32>
    %c8388607_i32 = arith.constant 8388607 : i32
    %28 = vector.broadcast %c8388607_i32 : i32 to vector<1x1xi32>
    %29 = arith.andi %23, %28 : vector<1x1xi32>
    %c127_i32 = arith.constant 127 : i32
    %30 = vector.broadcast %c127_i32 : i32 to vector<1x1xi32>
    %31 = arith.subi %27, %30 : vector<1x1xi32>
    %c0_i32 = arith.constant 0 : i32
    %32 = vector.broadcast %c0_i32 : i32 to vector<1x1xi32>
    %33 = arith.cmpi ne, %29, %32 : vector<1x1xi32>
    %34 = arith.extui %33 : vector<1x1xi1> to vector<1x1xi32>
    %35 = arith.addi %31, %34 : vector<1x1xi32>
    %cst_11 = arith.constant 1.000000e+00 : f32
    %36 = vector.broadcast %cst_11 : f32 to vector<1x1xf32>
    %37 = arith.cmpf ogt, %22, %36 : vector<1x1xf32>
    %c0_i32_12 = arith.constant 0 : i32
    %38 = vector.broadcast %c0_i32_12 : i32 to vector<1x1xi32>
    %39 = arith.select %37, %35, %38 : vector<1x1xi1>, vector<1x1xi32>
    %c0_i32_13 = arith.constant 0 : i32
    %c126_i32 = arith.constant 126 : i32
    %40 = vector.broadcast %c0_i32_13 : i32 to vector<1x1xi32>
    %41 = arith.maxsi %40, %39 : vector<1x1xi32>
    %42 = vector.broadcast %c126_i32 : i32 to vector<1x1xi32>
    %43 = arith.minsi %42, %41 : vector<1x1xi32>
    %c127_i32_14 = arith.constant 127 : i32
    %44 = vector.broadcast %c127_i32_14 : i32 to vector<1x1xi32>
    %45 = arith.subi %44, %43 : vector<1x1xi32>
    %c23_i32_15 = arith.constant 23 : i32
    %46 = vector.broadcast %c23_i32_15 : i32 to vector<1x1xi32>
    %47 = arith.shli %45, %46 : vector<1x1xi32>
    %48 = tpu.bitcast %47 : vector<1x1xi32> -> vector<1x1xf32>
    %49 = arith.mulf %19, %48 : vector<1x1xf32>
    %c0_16 = arith.constant 0 : index
    %c0_17 = arith.constant 0 : index
    %50 = vector.load %arg2[%c0_16, %c0_17] : memref<1x1xf32, #tpu.memory_space<vmem>>, vector<1x1xf32>
    tpu.vector_store %arg2[%c0_16, %c0_17], %49 {strides = array<i32>} : memref<1x1xf32, #tpu.memory_space<vmem>>, vector<1x1xf32>,
    return
  }
}

</mosaic_0001>

<bundles_post_ra>
// kernel: fixed_hidden_mlp.1
= control target key start
LH: loop header
LB: loop body
LE: loop exit
PB: predicated region body
PF: predicated region fallthrough
CT: control target
= control target key end

     0   :  { %vm26_vm0 = vcmask 1043456   ;;  %s223_s0 = inlined_call_operand.vmem [shape: f32[2,20], index: 0, kind: input, shape index: {}]   ;;  %s224_s1 = inlined_call_operand.vmem [shape: f32[56,20], index: 1, kind: input, shape index: {}]   ;;  %s225_s2 = inlined_call_operand.hbm [shape: f32[1,1], index: 2, kind: output, shape index: {}]  }
   0x1   :  { %v15_v0 = vld [vmem:[%s224_s1 + $0x10] sm:$0xf]  ;;  %v14_v1 = vld [vmem:[%s224_s1 + $0x8] sm:$0xff]  ;;  %v13_v2 = vld [vmem:[%s224_s1] sm:$0xff] }
   0x2   :  { %141 = vmatpush.msk.msra.mxu0 %vm26_vm0, %v15_v0 }
   0x3   :  { %7 = vsyncpa [#allocation3], 0  ;;  %v12_v3 = vld [vmem:[%s223_s0] sm:$0x3]  ;;  %vm22_vm1 = vcmask 162816   ;;  %v16_v6 = vld [vmem:[%s224_s1 + $0x18] sm:$0xff] }
   0x4   :  { %44 = vmatpush.msra.mxu0 %v14_v1  ;;  %v18_v4 = vld [vmem:[%s224_s1 + $0x28] sm:$0xf]  ;;  %v17_v5 = vld [vmem:[%s224_s1 + $0x20] sm:$0xff]  ;;  %v148_v7 = vld [vmem:[%s224_s1 + $0x30] ss:$0 sm:$0xff]  ;;  %vm82_vm2 = vcmask 1041408  }
   0x5   :  { %143 = vmatpush.msk.msra.mxu1 %vm26_vm0, %v18_v4  ;;  %v149_v11 = vld [vmem:[%s224_s1 + $0x31] ss:$0 sm:$0xff]  ;;  %vm84_vm3 = vcmask 158720   ;;  %v176_v35 = vmov 0   ;;  %s177_s1 = smov [#allocation2]   ;;  %s132_s29 = sshll.u32 %s225_s2, 4  ;;  %s133_s29 = int_to_ptr.hbm [resolvable:$true] %s132_s29 }
   0x6   :  { %45 = vmatpush.msra.mxu0 %v13_v2  ;;  %s130_s26 = sshll.u32 %s177_s1, 4  ;;  %vm123_vm8 = vcmask 0   ;;  %s131_s26 = int_to_ptr.vmem [resolvable:$true] %s130_s26 }
   0x7   :  { %142 = vmatmul.msk.f32.vlgmr.msra.gmra.mxu0 %vm22_vm1, %v12_v3  ;;  %72 = vmatpush.msra.mxu1 %v17_v5 }
   0x9   :  { %73 = vmatpush.msra.mxu1 %v16_v6 }
  0x84   :  { %v47_v8 = vpop.f32.mrf.mxu0 }
  0x85   :  { %v48_v9 = vadd.f32 %v148_v7, %v47_v8 }
  0x87   :  { %v50_v10 = vmax.f32 %v48_v9, 0.0 }
  0x89   :  { %144 = vmatmul.msk.f32.vlgmr.msra.gmra.mxu1 %vm22_vm1, %v50_v10 }
 0x106   :  { %v75_v12 = vpop.f32.mrf.mxu1 }
 0x107   :  { %v76_v13 = vadd.f32 %v149_v11, %v75_v12 }
 0x109   :  { %v78_v14 = vand.u32 2147483647, %v76_v13 }
 0x10b   :  { %v80_v15 = vrot.slane %v78_v14, 6 }
 0x10d   :  { %v83_v16 = vsel %vm82_vm2, %v76_v13, %v80_v15 }
 0x10e   :  { %v85_v17 = vsel %vm84_vm3, %v83_v16, 0.0 }
 0x10f   :  { %86 = vadd.xlane.f32.xlu0 %v85_v17 }
 0x182   :  { %v87_v18 = vpop.xlane.xlu0 %86 }
 0x183   :  { %v96_v19 = vrot.slane %v87_v18, 2  ;;  %v88_v23 = vsel %vm82_vm2, %v87_v18, 0.0 }
 0x184   :  { %v89_v26 = vrot.slane %v88_v23, 4 }
 0x185   :  { %v98_v20 = vsel %vm82_vm2, %v96_v19, 0.0 }
 0x186   :  { %v99_v21 = vrot.slane %v98_v20, 4  ;;  %v90_v29 = vadd.f32 %v89_v26, %v88_v23 }
 0x188   :  { %v100_v22 = vadd.f32 %v99_v21, %v98_v20  ;;  %v91_v33 = vrot.slane %v90_v29, 2 }
 0x18a   :  { %v101_v24 = vrot.slane %v100_v22, 2  ;;  %v92_v38 = vadd.f32 %v91_v33, %v90_v29 }
 0x18c   :  { %v102_v25 = vadd.f32 %v101_v24, %v100_v22  ;;  %v93_v41 = vrot.slane %v92_v38, 1 }
 0x18e   :  { %v103_v27 = vrot.slane %v102_v25, 1  ;;  %v94_v44 = vadd.f32 %v93_v41, %v92_v38 }
 0x190   :  { %v104_v28 = vadd.f32 %v103_v27, %v102_v25 }
 0x192   :  { %v106_v30 = vshra.s32 %v104_v28, 23  ;;  %v108_v31 = vand.u32 8388607, %v104_v28  ;;  %vm113_vm5 = vcmp.gt.f32.partialorder %v104_v28, 1.0 }
 0x194   :  { %v107_v32 = vand.u32 255, %v106_v30  ;;  %vm110_vm4 = vcmp.ne.s32.totalorder %v108_v31, 0 }
 0x195   :  { %v111_v36 = vsel %vm110_vm4, 1, %v176_v35 }
 0x196   :  { %v145_v34 = vadd.s32 4294967169, %v107_v32 }
 0x198   :  { %v112_v37 = vadd.s32 %v145_v34, %v111_v36 }
 0x19a   :  { %v114_v39 = vsel %vm113_vm5, %v112_v37, 0 }
 0x19b   :  { %vm115_vm6 = vcmp.gt.s32.totalorder %v114_v39, 0 }
 0x19c   :  { %v116_v40 = vsel %vm115_vm6, %v114_v39, 0 }
 0x19d   :  { %vm117_vm7 = vcmp.lt.s32.totalorder %v116_v40, 126 }
 0x19e   :  { %v118_v42 = vsel %vm117_vm7, %v116_v40, 126 }
 0x19f   :  { %v119_v43 = vsub.s32 127, %v118_v42 }
 0x1a1   :  { %v120_v45 = vshll.u32 %v119_v43, 23 }
 0x1a3   :  { %v122_v46 = vmul.f32 %v120_v45, %v94_v44 }
 0x1a5   :  { %124 = vst.msk [vmem:[#allocation2] sm:$0x1] %vm123_vm8, %v122_v46 }
 0x1a6   :  { %135 = dma.vmem_to_hbm [thread:$0]  %s131_s26, 16, %s133_s29, [#allocation3]  }
 0x1a7   :  { %174 = dma.done.wait [#allocation3], 16  }
 0x1a8   :  { %175 = vsyncadd [#allocation3], 4294967280 }
 0x1a9   :  { %140 = vsyncpa [#allocation3], 1 }

</bundles_post_ra>
